<compile_context>
chip_gen: v7x
topology: tpu7x:2x2x1
jax: 0.10.0
libtpu: 0.0.40
codegen_flags: <defaults>
</compile_context>

<pallas_src>
import functools

import jax
import jax.numpy as jnp
from jax.experimental import pallas as pl
from jax.experimental.pallas import tpu as pltpu


def _round_up(x, m):
    return ((x + m - 1) // m) * m


def _vmem_capacity_bytes():
    """Trace-time VMEM capacity query, with a conservative (v7x-sized) fallback."""
    try:
        cap = getattr(pltpu.get_tpu_info(), "vmem_capacity_bytes", None)
        if cap:
            return int(cap)
    except Exception:
        pass
    return 64 << 20  # v7x worst case


def _graph_emb_kernel(adj_ref, x_ref, w1_ref, b1_ref, w2_ref, b2_ref, o_ref, *,
                      vpu_agg):
    bt, n, _ = adj_ref.shape
    hp = x_ref.shape[-1]

    adj = adj_ref[...]          # (bt, Np, Np)  compute dtype
    w1 = w1_ref[...]            # (Hp, Hp)      compute dtype (pre-transposed)
    w2 = w2_ref[...]            # (Hp, Hp)
    b1 = b1_ref[...]            # (1, Hp)       f32
    b2 = b2_ref[...]            # (1, Hp)       f32
    cdt = adj.dtype

    if vpu_agg:
        # Tiny-N aggregation on the VPU: Np unrolled broadcast-mul-adds over
        # (bt, Np, Hp) slabs instead of bt under-filled (Np x Np) MXU matmuls.
        # bf16 products are exact in f32; accumulation is f32.
        adj_f32 = adj.astype(jnp.float32)            # hoisted once, reused by both layers

        def aggregate(x):                            # x: (bt, Np, Hp) compute dtype
            x_f32 = x.astype(jnp.float32)
            acc = adj_f32[:, :, 0:1] * x_f32[:, 0:1, :]
            for j in range(1, n):                    # n is static -> unrolled
                acc = acc + adj_f32[:, :, j:j + 1] * x_f32[:, j:j + 1, :]
            return acc                               # (bt, Np, Hp) f32
    else:
        def aggregate(x):
            return jnp.einsum("bij,bjh->bih", adj, x,
                              preferred_element_type=jnp.float32)

    x = x_ref[...]                                   # (bt, Np, Hp) compute dtype

    # ---- layer 1: ReLU(Linear(adj @ x)) ----
    a1 = aggregate(x).reshape(bt * n, hp)            # layout-free collapse (aligned dims)
    h1 = jnp.maximum(
        jnp.dot(a1.astype(cdt), w1, preferred_element_type=jnp.float32) + b1, 0.0)

    # ---- layer 2: ReLU(Linear(adj @ h1)) ----
    a2 = aggregate(h1.astype(cdt).reshape(bt, n, hp)).reshape(bt * n, hp)
    h2 = jnp.maximum(
        jnp.dot(a2.astype(cdt), w2, preferred_element_type=jnp.float32) + b2, 0.0)

    o_ref[...] = h2.reshape(bt, n, hp).astype(o_ref.dtype)


def graph_emb(adj, feats, w1, b1, w2, b2, *, compute_dtype=jnp.bfloat16,
              max_batch_tile=16):
    """adj: (B, N, N), feats: (B, N, H), w*: (H_out, H_in), b*: (H,) -> (B, N, H)."""
    B, N, H = feats.shape
    assert adj.shape == (B, N, N)
    out_dtype = feats.dtype

    c_elt = jnp.dtype(compute_dtype).itemsize
    o_elt = jnp.dtype(out_dtype).itemsize

    # --- tile-aligned padding (done once in XLA, outside the kernel) -------------
    sub = 8 * (4 // c_elt)                  # sublane quantum: 8 for f32, 16 for bf16
    Np = max(_round_up(N, sub), sub)
    Hp = max(_round_up(H, 128), 128)        # lane-dense feats/weights/output

    adj_p = jnp.pad(adj, ((0, 0), (0, Np - N), (0, Np - N))).astype(compute_dtype)
    feats_p = jnp.pad(feats, ((0, 0), (0, Np - N), (0, Hp - H))).astype(compute_dtype)
    w1_p = jnp.pad(w1.T, ((0, Hp - H), (0, Hp - H))).astype(compute_dtype)
    w2_p = jnp.pad(w2.T, ((0, Hp - H), (0, Hp - H))).astype(compute_dtype)
    b1_p = jnp.pad(b1, (0, Hp - H)).reshape(1, Hp).astype(jnp.float32)
    b2_p = jnp.pad(b2, (0, Hp - H)).reshape(1, Hp).astype(jnp.float32)

    # --- per-generation VMEM budget and batch-tile selection ---------------------
    vmem_cap = _vmem_capacity_bytes()
    budget = max(min(vmem_cap - (16 << 20), int(0.8 * vmem_cap)), 24 << 20)

    vpu_agg = Np <= 64                      # tiny-N: VPU aggregation, no MXU underfill
    lane_np = _round_up(Np, 128)            # VMEM lane footprint of adj's last dim
    # W1/W2/b1/b2 are double-buffered by the default pipeline.
    weight_bytes = 4 * Hp * Hp * c_elt + 2 * 2 * 8 * Hp * 4

    def step_bytes(bt):
        blk = bt * Np * lane_np * c_elt + bt * Np * Hp * c_elt + bt * Np * Hp * o_elt
        if vpu_agg:
            tmp = 4 * bt * Np * Hp * 4 + bt * Np * lane_np * 4   # f32 acc + adj copy
        else:
            tmp = 2 * bt * Np * Hp * 4
        return 2 * blk + weight_bytes + tmp + (4 << 20)          # 2x = double-buffered

    # Largest bt that (a) divides B, (b) fits the VMEM budget, and (c) leaves >= 2
    # grid steps when B >= 2 so the "parallel" axis can shard over v7x's two cores.
    # (For prime B this degrades to bt=1; acceptable, just a longer grid.)
    bt = 1
    for cand in range(min(max_batch_tile, B), 0, -1):
        if B % cand:
            continue
        if B >= 2 and (B // cand) < 2:
            continue
        if step_bytes(cand) <= budget:
            bt = cand
            break
    vmem_limit = int(min(max(step_bytes(bt), 32 << 20), budget))

    # Advisory cost hint for the XLA scheduler (logical flops, padded bytes).
    flops = 2 * B * (2 * N * N * H + 2 * N * H * H)
    bytes_accessed = int(B * Np * Np * c_elt + B * Np * Hp * (c_elt + o_elt)
                         + 2 * Hp * Hp * c_elt + 2 * Hp * 4)
    cost = pl.CostEstimate(flops=flops, transcendentals=0,
                           bytes_accessed=bytes_accessed)

    kernel = functools.partial(_graph_emb_kernel, vpu_agg=vpu_agg)

    out_p = pl.pallas_call(
        kernel,
        out_shape=jax.ShapeDtypeStruct((B, Np, Hp), out_dtype),
        grid_spec=pltpu.PrefetchScalarGridSpec(
            num_scalar_prefetch=0,
            grid=(B // bt,),
            in_specs=[
                pl.BlockSpec((bt, Np, Np), lambda i: (i, 0, 0)),   # adj (batch tile)
                pl.BlockSpec((bt, Np, Hp), lambda i: (i, 0, 0)),   # feats (batch tile)
                pl.BlockSpec((Hp, Hp), lambda i: (0, 0)),          # W1^T (shared)
                pl.BlockSpec((1, Hp), lambda i: (0, 0)),           # b1 (shared)
                pl.BlockSpec((Hp, Hp), lambda i: (0, 0)),          # W2^T (shared)
                pl.BlockSpec((1, Hp), lambda i: (0, 0)),           # b2 (shared)
            ],
            out_specs=pl.BlockSpec((bt, Np, Hp), lambda i: (i, 0, 0)),
        ),
        compiler_params=pltpu.CompilerParams(
            dimension_semantics=("parallel",),
            vmem_limit_bytes=vmem_limit,
        ),
        cost_estimate=cost,
    )(adj_p, feats_p, w1_p, b1_p, w2_p, b2_p)

    return out_p[:, :N, :H]


def _reference_f32(adj, feats, w1, b1, w2, b2):
    """Exact f32 semantics of the PyTorch module."""
    h = jnp.einsum("bnm,bmh->bnh", adj, feats)
    h = jnp.maximum(jnp.einsum("bnh,oh->bno", h, w1) + b1, 0.0)
    h = jnp.einsum("bnm,bmh->bnh", adj, h)
    h = jnp.maximum(jnp.einsum("bnh,oh->bno", h, w2) + b2, 0.0)
    return h


def _reference_matched(adj, feats, w1, b1, w2, b2, compute_dtype=jnp.bfloat16):
    """Same math with the kernel's bf16-operand / f32-accumulate cast points."""
    c = compute_dtype
    adj_c = adj.astype(c)
    h = jnp.einsum("bnm,bmh->bnh", adj_c, feats.astype(c),
                   preferred_element_type=jnp.float32)
    h = jnp.einsum("bnh,oh->bno", h.astype(c), w1.astype(c),
                   preferred_element_type=jnp.float32) + b1
    h = jnp.maximum(h, 0.0)
    h = jnp.einsum("bnm,bmh->bnh", adj_c, h.astype(c),
                   preferred_element_type=jnp.float32)
    h = jnp.einsum("bnh,oh->bno", h.astype(c), w2.astype(c),
                   preferred_element_type=jnp.float32) + b2
    h = jnp.maximum(h, 0.0)
    return h


if __name__ == "__main__":
    B, N, H = 2, 8, 32  # batch, nodes, hidden_dim

    key = jax.random.PRNGKey(0)
    k_adj, k_x, k_w1, k_b1, k_w2, k_b2 = jax.random.split(key, 6)

    adj = jax.random.uniform(k_adj, (B, N, N), dtype=jnp.float32)
    feats = jax.random.normal(k_x, (B, N, H), dtype=jnp.float32)

    # PyTorch-Linear-style init: U(-1/sqrt(H), 1/sqrt(H)), weight shape (H_out, H_in).
    bound = 1.0 / (H ** 0.5)
    w1 = jax.random.uniform(k_w1, (H, H), minval=-bound, maxval=bound, dtype=jnp.float32)
    b1 = jax.random.uniform(k_b1, (H,), minval=-bound, maxval=bound, dtype=jnp.float32)
    w2 = jax.random.uniform(k_w2, (H, H), minval=-bound, maxval=bound, dtype=jnp.float32)
    b2 = jax.random.uniform(k_b2, (H,), minval=-bound, maxval=bound, dtype=jnp.float32)

    out = jax.block_until_ready(graph_emb(adj, feats, w1, b1, w2, b2))
    assert out.shape == (B, N, H)
    assert out.dtype == feats.dtype

    # Check against a reference with the same bf16-operand / f32-accumulate cast points
    # (tolerance covers accumulation-order differences of the VPU aggregation path) ...
    ref_match = _reference_matched(adj, feats, w1, b1, w2, b2)
    assert jnp.allclose(out, ref_match, atol=1e-2, rtol=1e-2)
    # ... and a sanity check against the exact f32 module semantics
    # (tolerance relaxed for bf16 MXU operands; use compute_dtype=float32 for parity).
    ref_f32 = _reference_f32(adj, feats, w1, b1, w2, b2)
    assert jnp.allclose(out, ref_f32, atol=1e-1, rtol=1e-1)

    print("KERNEL_OK")
</pallas_src>

<mosaic_0001>
module attributes {stable_mosaic.version = 11 : i64} {
  func.func @_graph_emb_kernel(%arg0: i32, %arg1: memref<1x16x16xbf16, #tpu.memory_space<vmem>>, %arg2: memref<1x16x128xbf16, #tpu.memory_space<vmem>>, %arg3: memref<128x128xbf16, #tpu.memory_space<vmem>>, %arg4: memref<1x128xf32, #tpu.memory_space<vmem>>, %arg5: memref<128x128xbf16, #tpu.memory_space<vmem>>, %arg6: memref<1x128xf32, #tpu.memory_space<vmem>>, %arg7: memref<1x16x128xf32, #tpu.memory_space<vmem>>) attributes {dimension_semantics = [#tpu.dimension_semantics<parallel>], iteration_bounds = array<i64: 2>, scalar_prefetch = 0 : i64, scratch_operands = 0 : i64, tpu.core_type = #tpu.core_type<tc>, window_params = [{transform_indices = @transform_0, window_bounds = array<i64: 1, 16, 16>}, {transform_indices = @transform_1, window_bounds = array<i64: 1, 16, 128>}, {pipeline_mode = #tpu.pipeline_mode<synchronous>, transform_indices = @transform_2, window_bounds = array<i64: 128, 128>}, {pipeline_mode = #tpu.pipeline_mode<synchronous>, transform_indices = @transform_3, window_bounds = array<i64: 1, 128>}, {pipeline_mode = #tpu.pipeline_mode<synchronous>, transform_indices = @transform_4, window_bounds = array<i64: 128, 128>}, {pipeline_mode = #tpu.pipeline_mode<synchronous>, transform_indices = @transform_5, window_bounds = array<i64: 1, 128>}, {transform_indices = @transform_6, window_bounds = array<i64: 1, 16, 128>}]} {
    %c0 = arith.constant 0 : index
    %c0_0 = arith.constant 0 : index
    %c0_1 = arith.constant 0 : index
    %0 = vector.load %arg1[%c0, %c0_0, %c0_1] : memref<1x16x16xbf16, #tpu.memory_space<vmem>>, vector<1x16x16xbf16>
    %c0_2 = arith.constant 0 : index
    %c0_3 = arith.constant 0 : index
    %1 = vector.load %arg3[%c0_2, %c0_3] : memref<128x128xbf16, #tpu.memory_space<vmem>>, vector<128x128xbf16>
    %c0_4 = arith.constant 0 : index
    %c0_5 = arith.constant 0 : index
    %2 = vector.load %arg5[%c0_4, %c0_5] : memref<128x128xbf16, #tpu.memory_space<vmem>>, vector<128x128xbf16>
    %c0_6 = arith.constant 0 : index
    %c0_7 = arith.constant 0 : index
    %3 = vector.load %arg4[%c0_6, %c0_7] : memref<1x128xf32, #tpu.memory_space<vmem>>, vector<1x128xf32>
    %c0_8 = arith.constant 0 : index
    %c0_9 = arith.constant 0 : index
    %4 = vector.load %arg6[%c0_8, %c0_9] : memref<1x128xf32, #tpu.memory_space<vmem>>, vector<1x128xf32>
    %5 = arith.extf %0 : vector<1x16x16xbf16> to vector<1x16x16xf32>
    %c0_10 = arith.constant 0 : index
    %c0_11 = arith.constant 0 : index
    %c0_12 = arith.constant 0 : index
    %6 = vector.load %arg2[%c0_10, %c0_11, %c0_12] : memref<1x16x128xbf16, #tpu.memory_space<vmem>>, vector<1x16x128xbf16>
    %7 = arith.extf %6 : vector<1x16x128xbf16> to vector<1x16x128xf32>
    %8 = vector.extract_strided_slice %5 {offsets = [0, 0, 0], sizes = [1, 16, 1], strides = [1, 1, 1]} : vector<1x16x16xf32> to vector<1x16x1xf32>
    %9 = vector.extract_strided_slice %7 {offsets = [0, 0, 0], sizes = [1, 1, 128], strides = [1, 1, 1]} : vector<1x16x128xf32> to vector<1x1x128xf32>
    %10 = vector.broadcast %8 : vector<1x16x1xf32> to vector<1x16x128xf32>
    %11 = vector.broadcast %9 : vector<1x1x128xf32> to vector<1x16x128xf32>
    %12 = arith.mulf %10, %11 : vector<1x16x128xf32>
    %13 = vector.extract_strided_slice %5 {offsets = [0, 0, 1], sizes = [1, 16, 1], strides = [1, 1, 1]} : vector<1x16x16xf32> to vector<1x16x1xf32>
    %14 = vector.extract_strided_slice %7 {offsets = [0, 1, 0], sizes = [1, 1, 128], strides = [1, 1, 1]} : vector<1x16x128xf32> to vector<1x1x128xf32>
    %15 = vector.broadcast %13 : vector<1x16x1xf32> to vector<1x16x128xf32>
    %16 = vector.broadcast %14 : vector<1x1x128xf32> to vector<1x16x128xf32>
    %17 = arith.mulf %15, %16 : vector<1x16x128xf32>
    %18 = arith.addf %12, %17 : vector<1x16x128xf32>
    %19 = vector.extract_strided_slice %5 {offsets = [0, 0, 2], sizes = [1, 16, 1], strides = [1, 1, 1]} : vector<1x16x16xf32> to vector<1x16x1xf32>
    %20 = vector.extract_strided_slice %7 {offsets = [0, 2, 0], sizes = [1, 1, 128], strides = [1, 1, 1]} : vector<1x16x128xf32> to vector<1x1x128xf32>
    %21 = vector.broadcast %19 : vector<1x16x1xf32> to vector<1x16x128xf32>
    %22 = vector.broadcast %20 : vector<1x1x128xf32> to vector<1x16x128xf32>
    %23 = arith.mulf %21, %22 : vector<1x16x128xf32>
    %24 = arith.addf %18, %23 : vector<1x16x128xf32>
    %25 = vector.extract_strided_slice %5 {offsets = [0, 0, 3], sizes = [1, 16, 1], strides = [1, 1, 1]} : vector<1x16x16xf32> to vector<1x16x1xf32>
    %26 = vector.extract_strided_slice %7 {offsets = [0, 3, 0], sizes = [1, 1, 128], strides = [1, 1, 1]} : vector<1x16x128xf32> to vector<1x1x128xf32>
    %27 = vector.broadcast %25 : vector<1x16x1xf32> to vector<1x16x128xf32>
    %28 = vector.broadcast %26 : vector<1x1x128xf32> to vector<1x16x128xf32>
    %29 = arith.mulf %27, %28 : vector<1x16x128xf32>
    %30 = arith.addf %24, %29 : vector<1x16x128xf32>
    %31 = vector.extract_strided_slice %5 {offsets = [0, 0, 4], sizes = [1, 16, 1], strides = [1, 1, 1]} : vector<1x16x16xf32> to vector<1x16x1xf32>
    %32 = vector.extract_strided_slice %7 {offsets = [0, 4, 0], sizes = [1, 1, 128], strides = [1, 1, 1]} : vector<1x16x128xf32> to vector<1x1x128xf32>
    %33 = vector.broadcast %31 : vector<1x16x1xf32> to vector<1x16x128xf32>
    %34 = vector.broadcast %32 : vector<1x1x128xf32> to vector<1x16x128xf32>
    %35 = arith.mulf %33, %34 : vector<1x16x128xf32>
    %36 = arith.addf %30, %35 : vector<1x16x128xf32>
    %37 = vector.extract_strided_slice %5 {offsets = [0, 0, 5], sizes = [1, 16, 1], strides = [1, 1, 1]} : vector<1x16x16xf32> to vector<1x16x1xf32>
    %38 = vector.extract_strided_slice %7 {offsets = [0, 5, 0], sizes = [1, 1, 128], strides = [1, 1, 1]} : vector<1x16x128xf32> to vector<1x1x128xf32>
    %39 = vector.broadcast %37 : vector<1x16x1xf32> to vector<1x16x128xf32>
    %40 = vector.broadcast %38 : vector<1x1x128xf32> to vector<1x16x128xf32>
    %41 = arith.mulf %39, %40 : vector<1x16x128xf32>
    %42 = arith.addf %36, %41 : vector<1x16x128xf32>
    %43 = vector.extract_strided_slice %5 {offsets = [0, 0, 6], sizes = [1, 16, 1], strides = [1, 1, 1]} : vector<1x16x16xf32> to vector<1x16x1xf32>
    %44 = vector.extract_strided_slice %7 {offsets = [0, 6, 0], sizes = [1, 1, 128], strides = [1, 1, 1]} : vector<1x16x128xf32> to vector<1x1x128xf32>
    %45 = vector.broadcast %43 : vector<1x16x1xf32> to vector<1x16x128xf32>
    %46 = vector.broadcast %44 : vector<1x1x128xf32> to vector<1x16x128xf32>
    %47 = arith.mulf %45, %46 : vector<1x16x128xf32>
    %48 = arith.addf %42, %47 : vector<1x16x128xf32>
    %49 = vector.extract_strided_slice %5 {offsets = [0, 0, 7], sizes = [1, 16, 1], strides = [1, 1, 1]} : vector<1x16x16xf32> to vector<1x16x1xf32>
    %50 = vector.extract_strided_slice %7 {offsets = [0, 7, 0], sizes = [1, 1, 128], strides = [1, 1, 1]} : vector<1x16x128xf32> to vector<1x1x128xf32>
    %51 = vector.broadcast %49 : vector<1x16x1xf32> to vector<1x16x128xf32>
    %52 = vector.broadcast %50 : vector<1x1x128xf32> to vector<1x16x128xf32>
    %53 = arith.mulf %51, %52 : vector<1x16x128xf32>
    %54 = arith.addf %48, %53 : vector<1x16x128xf32>
    %55 = vector.extract_strided_slice %5 {offsets = [0, 0, 8], sizes = [1, 16, 1], strides = [1, 1, 1]} : vector<1x16x16xf32> to vector<1x16x1xf32>
    %56 = vector.extract_strided_slice %7 {offsets = [0, 8, 0], sizes = [1, 1, 128], strides = [1, 1, 1]} : vector<1x16x128xf32> to vector<1x1x128xf32>
    %57 = vector.broadcast %55 : vector<1x16x1xf32> to vector<1x16x128xf32>
    %58 = vector.broadcast %56 : vector<1x1x128xf32> to vector<1x16x128xf32>
    %59 = arith.mulf %57, %58 : vector<1x16x128xf32>
    %60 = arith.addf %54, %59 : vector<1x16x128xf32>
    %61 = vector.extract_strided_slice %5 {offsets = [0, 0, 9], sizes = [1, 16, 1], strides = [1, 1, 1]} : vector<1x16x16xf32> to vector<1x16x1xf32>
    %62 = vector.extract_strided_slice %7 {offsets = [0, 9, 0], sizes = [1, 1, 128], strides = [1, 1, 1]} : vector<1x16x128xf32> to vector<1x1x128xf32>
    %63 = vector.broadcast %61 : vector<1x16x1xf32> to vector<1x16x128xf32>
    %64 = vector.broadcast %62 : vector<1x1x128xf32> to vector<1x16x128xf32>
    %65 = arith.mulf %63, %64 : vector<1x16x128xf32>
    %66 = arith.addf %60, %65 : vector<1x16x128xf32>
    %67 = vector.extract_strided_slice %5 {offsets = [0, 0, 10], sizes = [1, 16, 1], strides = [1, 1, 1]} : vector<1x16x16xf32> to vector<1x16x1xf32>
    %68 = vector.extract_strided_slice %7 {offsets = [0, 10, 0], sizes = [1, 1, 128], strides = [1, 1, 1]} : vector<1x16x128xf32> to vector<1x1x128xf32>
    %69 = vector.broadcast %67 : vector<1x16x1xf32> to vector<1x16x128xf32>
    %70 = vector.broadcast %68 : vector<1x1x128xf32> to vector<1x16x128xf32>
    %71 = arith.mulf %69, %70 : vector<1x16x128xf32>
    %72 = arith.addf %66, %71 : vector<1x16x128xf32>
    %73 = vector.extract_strided_slice %5 {offsets = [0, 0, 11], sizes = [1, 16, 1], strides = [1, 1, 1]} : vector<1x16x16xf32> to vector<1x16x1xf32>
    %74 = vector.extract_strided_slice %7 {offsets = [0, 11, 0], sizes = [1, 1, 128], strides = [1, 1, 1]} : vector<1x16x128xf32> to vector<1x1x128xf32>
    %75 = vector.broadcast %73 : vector<1x16x1xf32> to vector<1x16x128xf32>
    %76 = vector.broadcast %74 : vector<1x1x128xf32> to vector<1x16x128xf32>
    %77 = arith.mulf %75, %76 : vector<1x16x128xf32>
    %78 = arith.addf %72, %77 : vector<1x16x128xf32>
    %79 = vector.extract_strided_slice %5 {offsets = [0, 0, 12], sizes = [1, 16, 1], strides = [1, 1, 1]} : vector<1x16x16xf32> to vector<1x16x1xf32>
    %80 = vector.extract_strided_slice %7 {offsets = [0, 12, 0], sizes = [1, 1, 128], strides = [1, 1, 1]} : vector<1x16x128xf32> to vector<1x1x128xf32>
    %81 = vector.broadcast %79 : vector<1x16x1xf32> to vector<1x16x128xf32>
    %82 = vector.broadcast %80 : vector<1x1x128xf32> to vector<1x16x128xf32>
    %83 = arith.mulf %81, %82 : vector<1x16x128xf32>
    %84 = arith.addf %78, %83 : vector<1x16x128xf32>
    %85 = vector.extract_strided_slice %5 {offsets = [0, 0, 13], sizes = [1, 16, 1], strides = [1, 1, 1]} : vector<1x16x16xf32> to vector<1x16x1xf32>
    %86 = vector.extract_strided_slice %7 {offsets = [0, 13, 0], sizes = [1, 1, 128], strides = [1, 1, 1]} : vector<1x16x128xf32> to vector<1x1x128xf32>
    %87 = vector.broadcast %85 : vector<1x16x1xf32> to vector<1x16x128xf32>
    %88 = vector.broadcast %86 : vector<1x1x128xf32> to vector<1x16x128xf32>
    %89 = arith.mulf %87, %88 : vector<1x16x128xf32>
    %90 = arith.addf %84, %89 : vector<1x16x128xf32>
    %91 = vector.extract_strided_slice %5 {offsets = [0, 0, 14], sizes = [1, 16, 1], strides = [1, 1, 1]} : vector<1x16x16xf32> to vector<1x16x1xf32>
    %92 = vector.extract_strided_slice %7 {offsets = [0, 14, 0], sizes = [1, 1, 128], strides = [1, 1, 1]} : vector<1x16x128xf32> to vector<1x1x128xf32>
    %93 = vector.broadcast %91 : vector<1x16x1xf32> to vector<1x16x128xf32>
    %94 = vector.broadcast %92 : vector<1x1x128xf32> to vector<1x16x128xf32>
    %95 = arith.mulf %93, %94 : vector<1x16x128xf32>
    %96 = arith.addf %90, %95 : vector<1x16x128xf32>
    %97 = vector.extract_strided_slice %5 {offsets = [0, 0, 15], sizes = [1, 16, 1], strides = [1, 1, 1]} : vector<1x16x16xf32> to vector<1x16x1xf32>
    %98 = vector.extract_strided_slice %7 {offsets = [0, 15, 0], sizes = [1, 1, 128], strides = [1, 1, 1]} : vector<1x16x128xf32> to vector<1x1x128xf32>
    %99 = vector.broadcast %97 : vector<1x16x1xf32> to vector<1x16x128xf32>
    %100 = vector.broadcast %98 : vector<1x1x128xf32> to vector<1x16x128xf32>
    %101 = arith.mulf %99, %100 : vector<1x16x128xf32>
    %102 = arith.addf %96, %101 : vector<1x16x128xf32>
    %103 = vector.shape_cast %102 : vector<1x16x128xf32> to vector<16x128xf32>
    %104 = arith.truncf %103 : vector<16x128xf32> to vector<16x128xbf16>
    %cst = arith.constant dense<0.000000e+00> : vector<16x128xf32>
    %105 = tpu.matmul %104, %1, %cst {dimension_numbers = #tpu.dot_dimension_numbers<[1], [0], [0], [1], [0, 0, 1, 1], [], []>} : vector<16x128xbf16>, vector<128x128xbf16>, vector<16x128xf32> -> vector<16x128xf32>
    %106 = vector.broadcast %3 : vector<1x128xf32> to vector<16x128xf32>
    %107 = arith.addf %105, %106 : vector<16x128xf32>
    %cst_13 = arith.constant 0.000000e+00 : f32
    %108 = vector.broadcast %cst_13 : f32 to vector<16x128xf32>
    %109 = arith.maximumf %107, %108 : vector<16x128xf32>
    %110 = arith.truncf %109 : vector<16x128xf32> to vector<16x128xbf16>
    %111 = vector.shape_cast %110 : vector<16x128xbf16> to vector<1x16x128xbf16>
    %112 = arith.extf %111 : vector<1x16x128xbf16> to vector<1x16x128xf32>
    %113 = vector.extract_strided_slice %5 {offsets = [0, 0, 0], sizes = [1, 16, 1], strides = [1, 1, 1]} : vector<1x16x16xf32> to vector<1x16x1xf32>
    %114 = vector.extract_strided_slice %112 {offsets = [0, 0, 0], sizes = [1, 1, 128], strides = [1, 1, 1]} : vector<1x16x128xf32> to vector<1x1x128xf32>
    %115 = vector.broadcast %113 : vector<1x16x1xf32> to vector<1x16x128xf32>
    %116 = vector.broadcast %114 : vector<1x1x128xf32> to vector<1x16x128xf32>
    %117 = arith.mulf %115, %116 : vector<1x16x128xf32>
    %118 = vector.extract_strided_slice %5 {offsets = [0, 0, 1], sizes = [1, 16, 1], strides = [1, 1, 1]} : vector<1x16x16xf32> to vector<1x16x1xf32>
    %119 = vector.extract_strided_slice %112 {offsets = [0, 1, 0], sizes = [1, 1, 128], strides = [1, 1, 1]} : vector<1x16x128xf32> to vector<1x1x128xf32>
    %120 = vector.broadcast %118 : vector<1x16x1xf32> to vector<1x16x128xf32>
    %121 = vector.broadcast %119 : vector<1x1x128xf32> to vector<1x16x128xf32>
    %122 = arith.mulf %120, %121 : vector<1x16x128xf32>
    %123 = arith.addf %117, %122 : vector<1x16x128xf32>
    %124 = vector.extract_strided_slice %5 {offsets = [0, 0, 2], sizes = [1, 16, 1], strides = [1, 1, 1]} : vector<1x16x16xf32> to vector<1x16x1xf32>
    %125 = vector.extract_strided_slice %112 {offsets = [0, 2, 0], sizes = [1, 1, 128], strides = [1, 1, 1]} : vector<1x16x128xf32> to vector<1x1x128xf32>
    %126 = vector.broadcast %124 : vector<1x16x1xf32> to vector<1x16x128xf32>
    %127 = vector.broadcast %125 : vector<1x1x128xf32> to vector<1x16x128xf32>
    %128 = arith.mulf %126, %127 : vector<1x16x128xf32>
    %129 = arith.addf %123, %128 : vector<1x16x128xf32>
    %130 = vector.extract_strided_slice %5 {offsets = [0, 0, 3], sizes = [1, 16, 1], strides = [1, 1, 1]} : vector<1x16x16xf32> to vector<1x16x1xf32>
    %131 = vector.extract_strided_slice %112 {offsets = [0, 3, 0], sizes = [1, 1, 128], strides = [1, 1, 1]} : vector<1x16x128xf32> to vector<1x1x128xf32>
    %132 = vector.broadcast %130 : vector<1x16x1xf32> to vector<1x16x128xf32>
    %133 = vector.broadcast %131 : vector<1x1x128xf32> to vector<1x16x128xf32>
    %134 = arith.mulf %132, %133 : vector<1x16x128xf32>
    %135 = arith.addf %129, %134 : vector<1x16x128xf32>
    %136 = vector.extract_strided_slice %5 {offsets = [0, 0, 4], sizes = [1, 16, 1], strides = [1, 1, 1]} : vector<1x16x16xf32> to vector<1x16x1xf32>
    %137 = vector.extract_strided_slice %112 {offsets = [0, 4, 0], sizes = [1, 1, 128], strides = [1, 1, 1]} : vector<1x16x128xf32> to vector<1x1x128xf32>
    %138 = vector.broadcast %136 : vector<1x16x1xf32> to vector<1x16x128xf32>
    %139 = vector.broadcast %137 : vector<1x1x128xf32> to vector<1x16x128xf32>
    %140 = arith.mulf %138, %139 : vector<1x16x128xf32>
    %141 = arith.addf %135, %140 : vector<1x16x128xf32>
    %142 = vector.extract_strided_slice %5 {offsets = [0, 0, 5], sizes = [1, 16, 1], strides = [1, 1, 1]} : vector<1x16x16xf32> to vector<1x16x1xf32>
    %143 = vector.extract_strided_slice %112 {offsets = [0, 5, 0], sizes = [1, 1, 128], strides = [1, 1, 1]} : vector<1x16x128xf32> to vector<1x1x128xf32>
    %144 = vector.broadcast %142 : vector<1x16x1xf32> to vector<1x16x128xf32>
    %145 = vector.broadcast %143 : vector<1x1x128xf32> to vector<1x16x128xf32>
    %146 = arith.mulf %144, %145 : vector<1x16x128xf32>
    %147 = arith.addf %141, %146 : vector<1x16x128xf32>
    %148 = vector.extract_strided_slice %5 {offsets = [0, 0, 6], sizes = [1, 16, 1], strides = [1, 1, 1]} : vector<1x16x16xf32> to vector<1x16x1xf32>
    %149 = vector.extract_strided_slice %112 {offsets = [0, 6, 0], sizes = [1, 1, 128], strides = [1, 1, 1]} : vector<1x16x128xf32> to vector<1x1x128xf32>
    %150 = vector.broadcast %148 : vector<1x16x1xf32> to vector<1x16x128xf32>
    %151 = vector.broadcast %149 : vector<1x1x128xf32> to vector<1x16x128xf32>
    %152 = arith.mulf %150, %151 : vector<1x16x128xf32>
    %153 = arith.addf %147, %152 : vector<1x16x128xf32>
    %154 = vector.extract_strided_slice %5 {offsets = [0, 0, 7], sizes = [1, 16, 1], strides = [1, 1, 1]} : vector<1x16x16xf32> to vector<1x16x1xf32>
    %155 = vector.extract_strided_slice %112 {offsets = [0, 7, 0], sizes = [1, 1, 128], strides = [1, 1, 1]} : vector<1x16x128xf32> to vector<1x1x128xf32>
    %156 = vector.broadcast %154 : vector<1x16x1xf32> to vector<1x16x128xf32>
    %157 = vector.broadcast %155 : vector<1x1x128xf32> to vector<1x16x128xf32>
    %158 = arith.mulf %156, %157 : vector<1x16x128xf32>
    %159 = arith.addf %153, %158 : vector<1x16x128xf32>
    %160 = vector.extract_strided_slice %5 {offsets = [0, 0, 8], sizes = [1, 16, 1], strides = [1, 1, 1]} : vector<1x16x16xf32> to vector<1x16x1xf32>
    %161 = vector.extract_strided_slice %112 {offsets = [0, 8, 0], sizes = [1, 1, 128], strides = [1, 1, 1]} : vector<1x16x128xf32> to vector<1x1x128xf32>
    %162 = vector.broadcast %160 : vector<1x16x1xf32> to vector<1x16x128xf32>
    %163 = vector.broadcast %161 : vector<1x1x128xf32> to vector<1x16x128xf32>
    %164 = arith.mulf %162, %163 : vector<1x16x128xf32>
    %165 = arith.addf %159, %164 : vector<1x16x128xf32>
    %166 = vector.extract_strided_slice %5 {offsets = [0, 0, 9], sizes = [1, 16, 1], strides = [1, 1, 1]} : vector<1x16x16xf32> to vector<1x16x1xf32>
    %167 = vector.extract_strided_slice %112 {offsets = [0, 9, 0], sizes = [1, 1, 128], strides = [1, 1, 1]} : vector<1x16x128xf32> to vector<1x1x128xf32>
    %168 = vector.broadcast %166 : vector<1x16x1xf32> to vector<1x16x128xf32>
    %169 = vector.broadcast %167 : vector<1x1x128xf32> to vector<1x16x128xf32>
    %170 = arith.mulf %168, %169 : vector<1x16x128xf32>
    %171 = arith.addf %165, %170 : vector<1x16x128xf32>
    %172 = vector.extract_strided_slice %5 {offsets = [0, 0, 10], sizes = [1, 16, 1], strides = [1, 1, 1]} : vector<1x16x16xf32> to vector<1x16x1xf32>
    %173 = vector.extract_strided_slice %112 {offsets = [0, 10, 0], sizes = [1, 1, 128], strides = [1, 1, 1]} : vector<1x16x128xf32> to vector<1x1x128xf32>
    %174 = vector.broadcast %172 : vector<1x16x1xf32> to vector<1x16x128xf32>
    %175 = vector.broadcast %173 : vector<1x1x128xf32> to vector<1x16x128xf32>
    %176 = arith.mulf %174, %175 : vector<1x16x128xf32>
    %177 = arith.addf %171, %176 : vector<1x16x128xf32>
    %178 = vector.extract_strided_slice %5 {offsets = [0, 0, 11], sizes = [1, 16, 1], strides = [1, 1, 1]} : vector<1x16x16xf32> to vector<1x16x1xf32>
    %179 = vector.extract_strided_slice %112 {offsets = [0, 11, 0], sizes = [1, 1, 128], strides = [1, 1, 1]} : vector<1x16x128xf32> to vector<1x1x128xf32>
    %180 = vector.broadcast %178 : vector<1x16x1xf32> to vector<1x16x128xf32>
    %181 = vector.broadcast %179 : vector<1x1x128xf32> to vector<1x16x128xf32>
    %182 = arith.mulf %180, %181 : vector<1x16x128xf32>
    %183 = arith.addf %177, %182 : vector<1x16x128xf32>
    %184 = vector.extract_strided_slice %5 {offsets = [0, 0, 12], sizes = [1, 16, 1], strides = [1, 1, 1]} : vector<1x16x16xf32> to vector<1x16x1xf32>
    %185 = vector.extract_strided_slice %112 {offsets = [0, 12, 0], sizes = [1, 1, 128], strides = [1, 1, 1]} : vector<1x16x128xf32> to vector<1x1x128xf32>
    %186 = vector.broadcast %184 : vector<1x16x1xf32> to vector<1x16x128xf32>
    %187 = vector.broadcast %185 : vector<1x1x128xf32> to vector<1x16x128xf32>
    %188 = arith.mulf %186, %187 : vector<1x16x128xf32>
    %189 = arith.addf %183, %188 : vector<1x16x128xf32>
    %190 = vector.extract_strided_slice %5 {offsets = [0, 0, 13], sizes = [1, 16, 1], strides = [1, 1, 1]} : vector<1x16x16xf32> to vector<1x16x1xf32>
    %191 = vector.extract_strided_slice %112 {offsets = [0, 13, 0], sizes = [1, 1, 128], strides = [1, 1, 1]} : vector<1x16x128xf32> to vector<1x1x128xf32>
    %192 = vector.broadcast %190 : vector<1x16x1xf32> to vector<1x16x128xf32>
    %193 = vector.broadcast %191 : vector<1x1x128xf32> to vector<1x16x128xf32>
    %194 = arith.mulf %192, %193 : vector<1x16x128xf32>
    %195 = arith.addf %189, %194 : vector<1x16x128xf32>
    %196 = vector.extract_strided_slice %5 {offsets = [0, 0, 14], sizes = [1, 16, 1], strides = [1, 1, 1]} : vector<1x16x16xf32> to vector<1x16x1xf32>
    %197 = vector.extract_strided_slice %112 {offsets = [0, 14, 0], sizes = [1, 1, 128], strides = [1, 1, 1]} : vector<1x16x128xf32> to vector<1x1x128xf32>
    %198 = vector.broadcast %196 : vector<1x16x1xf32> to vector<1x16x128xf32>
    %199 = vector.broadcast %197 : vector<1x1x128xf32> to vector<1x16x128xf32>
    %200 = arith.mulf %198, %199 : vector<1x16x128xf32>
    %201 = arith.addf %195, %200 : vector<1x16x128xf32>
    %202 = vector.extract_strided_slice %5 {offsets = [0, 0, 15], sizes = [1, 16, 1], strides = [1, 1, 1]} : vector<1x16x16xf32> to vector<1x16x1xf32>
    %203 = vector.extract_strided_slice %112 {offsets = [0, 15, 0], sizes = [1, 1, 128], strides = [1, 1, 1]} : vector<1x16x128xf32> to vector<1x1x128xf32>
    %204 = vector.broadcast %202 : vector<1x16x1xf32> to vector<1x16x128xf32>
    %205 = vector.broadcast %203 : vector<1x1x128xf32> to vector<1x16x128xf32>
    %206 = arith.mulf %204, %205 : vector<1x16x128xf32>
    %207 = arith.addf %201, %206 : vector<1x16x128xf32>
    %208 = vector.shape_cast %207 : vector<1x16x128xf32> to vector<16x128xf32>
    %209 = arith.truncf %208 : vector<16x128xf32> to vector<16x128xbf16>
    %cst_14 = arith.constant dense<0.000000e+00> : vector<16x128xf32>
    %210 = tpu.matmul %209, %2, %cst_14 {dimension_numbers = #tpu.dot_dimension_numbers<[1], [0], [0], [1], [0, 0, 1, 1], [], []>} : vector<16x128xbf16>, vector<128x128xbf16>, vector<16x128xf32> -> vector<16x128xf32>
    %211 = vector.broadcast %4 : vector<1x128xf32> to vector<16x128xf32>
    %212 = arith.addf %210, %211 : vector<16x128xf32>
    %cst_15 = arith.constant 0.000000e+00 : f32
    %213 = vector.broadcast %cst_15 : f32 to vector<16x128xf32>
    %214 = arith.maximumf %212, %213 : vector<16x128xf32>
    %215 = vector.shape_cast %214 : vector<16x128xf32> to vector<1x16x128xf32>
    %c0_16 = arith.constant 0 : index
    %c0_17 = arith.constant 0 : index
    %c0_18 = arith.constant 0 : index
    %216 = vector.load %arg7[%c0_16, %c0_17, %c0_18] : memref<1x16x128xf32, #tpu.memory_space<vmem>>, vector<1x16x128xf32>
    tpu.vector_store %arg7[%c0_16, %c0_17, %c0_18], %215 {strides = array<i32>} : memref<1x16x128xf32, #tpu.memory_space<vmem>>, vector<1x16x128xf32>,
    return
  }
  func.func @transform_0(%arg0: i32) -> (i32, i32, i32) {
    %c0_i32 = arith.constant 0 : i32
    %c0_i32_0 = arith.constant 0 : i32
    %c0_i32_1 = arith.constant 0 : i32
    return %arg0, %c0_i32, %c0_i32_0 : i32, i32, i32
  }
  func.func @transform_1(%arg0: i32) -> (i32, i32, i32) {
    %c0_i32 = arith.constant 0 : i32
    %c0_i32_0 = arith.constant 0 : i32
    %c0_i32_1 = arith.constant 0 : i32
    return %arg0, %c0_i32, %c0_i32_0 : i32, i32, i32
  }
  func.func @transform_2(%arg0: i32) -> (i32, i32) {
    %c0_i32 = arith.constant 0 : i32
    %c0_i32_0 = arith.constant 0 : i32
    %c0_i32_1 = arith.constant 0 : i32
    return %c0_i32, %c0_i32_0 : i32, i32
  }
  func.func @transform_3(%arg0: i32) -> (i32, i32) {
    %c0_i32 = arith.constant 0 : i32
    %c0_i32_0 = arith.constant 0 : i32
    %c0_i32_1 = arith.constant 0 : i32
    return %c0_i32, %c0_i32_0 : i32, i32
  }
  func.func @transform_4(%arg0: i32) -> (i32, i32) {
    %c0_i32 = arith.constant 0 : i32
    %c0_i32_0 = arith.constant 0 : i32
    %c0_i32_1 = arith.constant 0 : i32
    return %c0_i32, %c0_i32_0 : i32, i32
  }
  func.func @transform_5(%arg0: i32) -> (i32, i32) {
    %c0_i32 = arith.constant 0 : i32
    %c0_i32_0 = arith.constant 0 : i32
    %c0_i32_1 = arith.constant 0 : i32
    return %c0_i32, %c0_i32_0 : i32, i32
  }
  func.func @transform_6(%arg0: i32) -> (i32, i32, i32) {
    %c0_i32 = arith.constant 0 : i32
    %c0_i32_0 = arith.constant 0 : i32
    %c0_i32_1 = arith.constant 0 : i32
    return %arg0, %c0_i32, %c0_i32_0 : i32, i32, i32
  }
}

</mosaic_0001>

<bundles_post_ra>
// kernel: tpu_custom_call.1
= control target key start
LH: loop header
LB: loop body
LE: loop exit
PB: predicated region body
PF: predicated region fallthrough
CT: control target
= control target key end

     0   :  { %s2256_s0 = inlined_call_operand.hbm [shape: bf16[2,16,16], index: 0, kind: input, shape index: {}]   ;;  %s2257_s1 = inlined_call_operand.hbm [shape: bf16[2,16,128], index: 1, kind: input, shape index: {}]   ;;  %s2258_s2 = inlined_call_operand.hbm [shape: bf16[128,128], index: 2, kind: input, shape index: {}]   ;;  %s2259_s3 = inlined_call_operand.vmem [shape: f32[1,128], index: 3, kind: input, shape index: {}]   ;;  %s2260_s4 = inlined_call_operand.hbm [shape: bf16[128,128], index: 4, kind: input, shape index: {}]   ;;  %s2261_s5 = inlined_call_operand.vmem [shape: f32[1,128], index: 5, kind: input, shape index: {}]   ;;  %s2262_s6 = inlined_call_operand.hbm [shape: f32[2,16,128], index: 6, kind: output, shape index: {}]  }
   0x1   :  { %2280 = sst [smem:[#allocation16_spill]] %s2256_s0 }
   0x2   :  { %2281 = sst [smem:[#allocation17_spill]] %s2258_s2 }
   0x3   :  { %2282 = sst [smem:[#allocation18_spill]] %s2260_s4 }
   0x4   :  { %11 = vsyncpa [#allocation3], 0 }
   0x5   :  { %13 = vsyncpa [#allocation3 + $0x1], 0 }
   0x6   :  { %14 = vsyncpa [#allocation6], 0 }
   0x7   :  { %16 = vsyncpa [#allocation6 + $0x1], 0 }
   0x8   :  { %17 = vsyncpa [#allocation9], 0 }
   0x9   :  { %18 = vsyncpa [#allocation4], 0 }
   0xa   :  { %20 = vsyncpa [#allocation4 + $0x1], 0  ;;  %s1668_s21 = smov 0   ;;  %s1670_s22 = smov 0  }
   0xb   :  { %s1672_s23 = smov 0   ;;  %s1674_s24 = smov 0  }
   0xc LB: > { %s1689_s25 = sadd.s32 4294967295, %s1604_s24   ;;  %s1094_s26 = sadd.s32 4294967294, %s1604_s24   ;;  %s1604_s24 = sphi %s1674_s24, %s2316_s24   ;;  %s1600_s23 = sphi %s1672_s23, %s2315_s23   ;;  %s1596_s22 = sphi %s1670_s22, %s2314_s22   ;;  %s1592_s21 = sphi %s1668_s21, %s2313_s21  }
   0xd   : > { %p46_p0 = scmp.ne.s32.totalorder %s1596_s22, %s1592_s21  ;;  %p2263_p1 = scmp.eq.s32.totalorder %s1689_s25, 0 }
   0xe   : > { %p186_p3 = scmp.eq.s32.totalorder %s1094_s26, 1  ;;  %p1095_p5 = scmp.ge.s32.totalorder %s1604_s24, 1 }
   0xf   : > { %p1698_p4 = por %p2263_p1, %p46_p0  ;;  %p193_p7 = scmp.lt.s32.totalorder %s1604_s24, 3 }
  0x10   : > { %p1703_p6 = por %p186_p3, %p46_p0  ;;  %s1606_s30 = smov [#allocation7]  }
  0x11   : > { %s2283_s27 = scalar_select %p1698_p4, 1, 0 }
  0x12   : > { %s2284_s28 = scalar_select %p1703_p6, 1, 0 }
  0x13   : > { %p1708_p8 = pnand %p1095_p5, %p193_p7  ;;  %s205_s7 = sshll.u32 %s1606_s30, 4  ;;  %s1712_s7 = int_to_ptr.vmem [resolvable:$true] %s205_s7 }
  0x14   : > { %s1607_s9 = smov [#allocation8]   ;;  %s2287_s2 = sld [smem:[#allocation17_spill]] }
  0x15   : > { %p1217_p9 = pneg %p1708_p8  ;;  %s221_s10 = sshll.u32 %s1607_s9, 4  ;;  %s1723_s10 = int_to_ptr.vmem [resolvable:$true] %s221_s10 }
  0x17   : > { %p1719_p11 = pnand %p1217_p9, %p2263_p1 }
  0x19   : > { %p1412_p13 = pneg %p1719_p11 }
  0x1a   : > { %s1410_s13 = scalar_lea.hbm %s2287_s2, 1024 }
  0x1b   : > { %p1411_p12 = scmp.ne.s32.totalorder %s2287_s2, %s1410_s13  ;;  %p1417_p5 = scmp.lt.u32.totalorder %s1410_s13, %s2287_s2 }
  0x1d   : > { %p1413_p0 = pnand %p1412_p13, %p1411_p12 }
  0x1f   : > { %p1414_p3 = pneg %p1413_p0 }
  0x21   : > { %p1419_p7 = pnand %p1417_p5, %p1414_p3 }
  0x23   : > { %1422 = shalt.err (!%p1419_p7)
}
  0x24   : > { %s1423_s18 = scalar_lea.vmem %s1712_s7, 1024  ;;  %p1431_p2 = scmp.lt.s32.totalorder %s1712_s7, %s1712_s7 }
  0x25   : > { %p1424_p9 = scmp.ne.s32.totalorder %s1712_s7, %s1423_s18  ;;  %p1432_p12 = scmp.lt.s32.totalorder %s1423_s18, %s1423_s18 }
  0x27   : > { %p1426_p10 = pnand %p1424_p9, %p1412_p13  ;;  %p1433_p0 = por %p1432_p12, %p1431_p2 }
  0x29   : > { %p1427_p1 = pneg %p1426_p10 }
  0x2b   : > { %p1434_p6 = pnand %p1433_p0, %p1427_p1 }
  0x2d   : > { %1437 = shalt.err (!%p1434_p6)
}
  0x2e   : > { %s2264_s19 = smov 64   ;;  %s2266_s20 = smov 4  }
  0x2f   : > { %1220 = dma.hbm_to_vmem [thread:$0]  (!%p1719_p11), %s2287_s2, 1024, %s1712_s7, [#allocation6], %s2264_s19, %s2264_s19, %s2266_s20  }
  0x30   : > { %s2288_s4 = sld [smem:[#allocation18_spill]] }
  0x36   : > { %s1438_s12 = scalar_lea.hbm %s2288_s4, 1024 }
  0x37   : > { %p1439_p1 = scmp.ne.s32.totalorder %s2288_s4, %s1438_s12  ;;  %p1445_p10 = scmp.lt.u32.totalorder %s1438_s12, %s2288_s4 }
  0x39   : > { %p1441_p2 = pnand %p1439_p1, %p1412_p13 }
  0x3b   : > { %p1442_p6 = pneg %p1441_p2 }
  0x3d   : > { %p1447_p3 = pnand %p1445_p10, %p1442_p6 }
  0x3f   : > { %1450 = shalt.err (!%p1447_p3)
}
  0x40   : > { %s1451_s7 = scalar_lea.vmem %s1723_s10, 1024  ;;  %p1459_p12 = scmp.lt.s32.totalorder %s1723_s10, %s1723_s10 }
  0x41   : > { %p1452_p5 = scmp.ne.s32.totalorder %s1723_s10, %s1451_s7  ;;  %p1460_p0 = scmp.lt.s32.totalorder %s1451_s7, %s1451_s7 }
  0x43   : > { %p1454_p7 = pnand %p1452_p5, %p1412_p13  ;;  %p1461_p1 = por %p1460_p0, %p1459_p12 }
  0x45   : > { %p1455_p9 = pneg %p1454_p7 }
  0x47   : > { %p1462_p2 = pnand %p1461_p1, %p1455_p9 }
  0x49   : > { %1465 = shalt.err (!%p1462_p2)
}
  0x4a   : > { %1223 = dma.hbm_to_vmem [thread:$0]  (!%p1719_p11), %s2288_s4, 1024, %s1723_s10, [#allocation9], %s2264_s19, %s2264_s19, %s2266_s20  }
  0x4b   : > { %s1784_s8 = sadd.s32 1, %s1604_s24   ;;  %s33_s26 = sadd.s32 1, %s1600_s23 }
  0x4c   : > { %s30_s30 = ssub.s32 %s1604_s24, %s1784_s8  ;;  %p40_p13 = scmp.ne.s32.totalorder %s1600_s23, %s1596_s22 }
  0x4d   : > { %p31_p6 = scmp.eq.s32.totalorder %s30_s30, 0  ;;  %p41_p10 = scmp.eq.s32.totalorder %s1604_s24, 0 }
  0x4e   : > { %p2289_p3 = scmp.eq.s32.totalorder %s1689_s25, 1  ;;  %p1237_p7 = scmp.lt.s32.totalorder %s1604_s24, 2 }
  0x4f   : > { %s1800_s11 = scalar_select %p31_p6, %s1600_s23, %s33_s26  }
  0x50   : > { %p1794_p5 = por %p2289_p3, %p40_p13  ;;  %p42_p9 = por %p41_p10, %p40_p13 }
  0x51   : > { %s238_s12 = sand.u32 1, %s1600_s23   ;;  %s1134_s10 = sshll.u32 %s1604_s24, 7 }
  0x52   : > { %s2290_s9 = scalar_select %p1794_p5, 1, 0 }
  0x53   : > { %s1099_s13 = sshll.u32 %s238_s12, 3  ;;  %s2291_s0 = sld [smem:[#allocation16_spill]] }
  0x54   : > { %s242_s7 = scalar_lea.vmem [#allocation2], %s1099_s13  ;;  %p1811_p11 = pnand %p1237_p7, %p42_p9 }
  0x55   : > { %s249_s17 = sshll.u32 %s242_s7, 4  ;;  %s1818_s14 = scalar_lea.hbm %s2257_s1, %s1134_s10  ;;  %s1809_s17 = int_to_ptr.vmem [resolvable:$true] %s249_s17 }
  0x56   : > { %s263_s15 = scalar_lea.vmem [#allocation5], %s1099_s13  ;;  %s1822_s20 = scalar_lea.sflag [#allocation3], %s238_s12 }
  0x57   : > { %s1820_s19 = sshll.u32 %s263_s15, 4  ;;  %p1468_p0 = pneg %p1811_p11  ;;  %s1854_s19 = int_to_ptr.vmem [resolvable:$true] %s1820_s19 }
  0x59   : > { %s1807_s16 = scalar_lea.hbm %s2291_s0, %s1134_s10  ;;  %s1471_s26 = scalar_lea.hbm %s2291_s0, 256 }
  0x5a   : > { %s1466_s7 = scalar_lea.hbm %s1807_s16, 128  ;;  %p1472_p13 = scmp.lt.u32.totalorder %s1807_s16, %s2291_s0 }
  0x5b   : > { %p1467_p12 = scmp.ne.s32.totalorder %s1807_s16, %s1466_s7  ;;  %p1473_p6 = scmp.lt.u32.totalorder %s1471_s26, %s1466_s7 }
  0x5c   : > { %p1475_p3 = scmp.lt.u32.totalorder %s1466_s7, %s1807_s16 }
  0x5d   : > { %p1469_p1 = pnand %p1468_p0, %p1467_p12  ;;  %p1474_p10 = por %p1473_p6, %p1472_p13 }
  0x5f   : > { %p1470_p2 = pneg %p1469_p1  ;;  %p1476_p7 = por %p1475_p3, %p1474_p10 }
  0x61   : > { %p1477_p9 = pnand %p1476_p7, %p1470_p2 }
  0x63   : > { %1480 = shalt.err (!%p1477_p9)
}
  0x64   : > { %s1481_s12 = scalar_lea.vmem %s1809_s17, 128  ;;  %s1610_s2 = smov [#allocation2]  }
  0x65   : > { %p1482_p12 = scmp.ne.s32.totalorder %s1809_s17, %s1481_s12  ;;  %s1486_s4 = sshll.u32 %s1610_s2, 4  ;;  %s1487_s4 = int_to_ptr.vmem [resolvable:$false] %s1486_s4 }
  0x66   : > { %s1488_s13 = scalar_lea.vmem %s1487_s4, 256  ;;  %p1489_p4 = scmp.lt.s32.totalorder %s1809_s17, %s1487_s4 }
  0x67   : > { %p1484_p1 = pnand %p1482_p12, %p1468_p0  ;;  %p1490_p13 = scmp.lt.s32.totalorder %s1488_s13, %s1481_s12 }
  0x69   : > { %p1485_p5 = pneg %p1484_p1  ;;  %p1491_p6 = por %p1490_p13, %p1489_p4 }
  0x6b   : > { %p1492_p10 = pnand %p1491_p6, %p1485_p5 }
  0x6d   : > { %1495 = shalt.err (!%p1492_p10)
}
  0x6e   : > { %s2293_s15 = smov 4   ;;  %s2294_s7 = smov 64  }
  0x6f   : > { %1227 = dma.hbm_to_vmem [thread:$0]  (!%p1811_p11), %s1807_s16, 128, %s1809_s17, %s1822_s20, %s2294_s7, %s2294_s7, %s2293_s15  }
  0x70   : > { %s259_s26 = sand.u32 1, %s1604_s24   ;;  %s1496_s10 = scalar_lea.hbm %s1818_s14, 128 }
  0x71   : > { %s1857_s30 = scalar_lea.sflag [#allocation6], %s259_s26  ;;  %p1497_p4 = scmp.ne.s32.totalorder %s1818_s14, %s1496_s10 }
  0x72   : > { %s1501_s4 = scalar_lea.hbm %s2257_s1, 256  ;;  %p1502_p3 = scmp.lt.u32.totalorder %s1818_s14, %s2257_s1 }
  0x73   : > { %p1499_p5 = pnand %p1497_p4, %p1468_p0  ;;  %p1503_p7 = scmp.lt.u32.totalorder %s1501_s4, %s1496_s10 }
  0x74   : > { %p1505_p12 = scmp.lt.u32.totalorder %s1496_s10, %s1818_s14 }
  0x75   : > { %p1500_p2 = pneg %p1499_p5  ;;  %p1504_p9 = por %p1503_p7, %p1502_p3 }
  0x77   : > { %p1506_p1 = por %p1505_p12, %p1504_p9 }
  0x79   : > { %p1507_p13 = pnand %p1506_p1, %p1500_p2 }
  0x7b   : > { %1510 = shalt.err (!%p1507_p13)
}
  0x7c   : > { %s1511_s20 = scalar_lea.vmem %s1854_s19, 128  ;;  %s1611_s16 = smov [#allocation5]  }
  0x7d   : > { %p1512_p6 = scmp.ne.s32.totalorder %s1854_s19, %s1511_s20  ;;  %s1516_s17 = sshll.u32 %s1611_s16, 4  ;;  %s1517_s17 = int_to_ptr.vmem [resolvable:$false] %s1516_s17 }
  0x7e   : > { %s1518_s0 = scalar_lea.vmem %s1517_s17, 256  ;;  %p1519_p5 = scmp.lt.s32.totalorder %s1854_s19, %s1517_s17 }
  0x7f   : > { %p1514_p10 = pnand %p1512_p6, %p1468_p0  ;;  %p1520_p3 = scmp.lt.s32.totalorder %s1518_s0, %s1511_s20 }
  0x81   : > { %p1515_p4 = pneg %p1514_p10  ;;  %p1521_p7 = por %p1520_p3, %p1519_p5 }
  0x83   : > { %p1522_p9 = pnand %p1521_p7, %p1515_p4 }
  0x85   : > { %1525 = shalt.err (!%p1522_p9)
}
  0x86   : > { %1230 = dma.hbm_to_vmem [thread:$0]  (!%p1811_p11), %s1818_s14, 128, %s1854_s19, %s1857_s30, %s2294_s7, %s2294_s7, %s2293_s15  }
  0x87   : > { %282 = sbr.rel (%p1708_p8) target bundleno = 829 (0x33d), region = 44  ;;  %s1889_s26 = sand.u32 (!%p1708_p8), 1, %s1596_s22  }
  0x88   : > { %s1106_s10 = sshll.u32 (!%p1708_p8), %s1889_s26, 3  ;;  %s285_s12 = scalar_lea.sflag (!%p1708_p8), [#allocation3], %s1889_s26 }
  0x89   : > { %s288_s2 = scalar_lea.vmem (!%p1708_p8), [#allocation2], %s1106_s10  ;;  %p2295_p0 = scmp.ne.s32.totalorder (!%p1708_p8), %s2283_s27, 0 }
  0x8e   : > { %1571 = dma.done.wait (%p2295_p0), %s285_s12, 128  }
  0x8f   : > { %1573 = vsyncadd (%p2295_p0), %s285_s12, 4294967168  ;;  %s293_s19 = sand.u32 1, %s1689_s25   ;;  %s1898_s29 = scalar_lea.vmem [#allocation5], %s1106_s10 }
  0x90   : > { %s294_s18 = scalar_lea.sflag [#allocation6], %s293_s19 }
  0x91   : > { %1575 = dma.done.wait (%p2295_p0), %s294_s18, 128  }
  0x92   : > { %1577 = vsyncadd (%p2295_p0), %s294_s18, 4294967168  ;;  %p2296_p8 = scmp.eq.s32.totalorder %s1689_s25, 0 }
  0x94   : > { %1579 = dma.done.wait (%p2296_p8), [#allocation6], 1024   ;;  %p2297_p11 = pmov %p2296_p8 }
  0x95   : > { %p2298_p2 = pmov %p2296_p8 }
  0x96   : > { %1581 = vsyncadd (%p2297_p11), [#allocation6], 4294966272 }
  0x97   : > { %1583 = dma.done.wait (%p2298_p2), [#allocation9], 1024   ;;  %p2299_p12 = pmov %p2298_p2 }
  0x98   : > { %v1612_v0 = vmov 2   ;;  %v1613_v1 = vmov 0   ;;  %v1138_v2 = vld [vmem:[%s288_s2] sm:$0xff]   ;;  %v1614_v6 = vmov 3   ;;  %v1615_v7 = vmov 1   ;;  %v1396_v19 = vld [vmem:[#allocation7 + $0x10] sm:$0xff]  }
  0x99   : > { %1585 = vsyncadd (%p2299_p12), [#allocation9], 4294966272  ;;  %1309 = vset.pattern.permute.xlu1 %v1612_v0  ;;  %1297 = vset.pattern.permute.xlu0 %v1613_v1  ;;  %v1139_v3 = vunpack.c.l.bf16 %v1138_v2  ;;  %v1140_v4 = vunpack.c.h.bf16 %v1138_v2  ;;  %v1616_v8 = vmov 4   ;;  %v1617_v9 = vmov 5   ;;  %v1394_v14 = vld [vmem:[#allocation7] sm:$0xff]   ;;  %v1395_v18 = vld [vmem:[#allocation7 + $0x8] sm:$0xff]  }
  0x9a   : > { %v1618_v10 = vmov 6   ;;  %v1619_v11 = vmov 8   ;;  %v1620_v12 = vmov 7   ;;  %v1621_v13 = vmov 11   ;;  %v1397_v22 = vld [vmem:[#allocation7 + $0x18] sm:$0xff]   ;;  %v1398_v24 = vld [vmem:[#allocation7 + $0x20] sm:$0xff]  }
  0x9b   : > { %v1912_v5 = vpack.i.bf16 %v1140_v4, %v1139_v3  ;;  %v1622_v15 = vmov 0.0   ;;  %v1623_v16 = vmov 9   ;;  %v1624_v17 = vmov 14   ;;  %v1399_v26 = vld [vmem:[#allocation7 + $0x28] sm:$0xff]   ;;  %v1400_v27 = vld [vmem:[#allocation7 + $0x30] sm:$0xff]   ;;  %v1401_v28 = vld [vmem:[#allocation7 + $0x38] sm:$0xff]  }
  0x9c   : > { %1163 = vmatprep.subr.bf16.mxu0 %v1622_v15  ;;  %1183 = vmatprep.subr.bf16.mxu1 %v1622_v15  ;;  %v1625_v20 = vmov 10   ;;  %v1626_v21 = vmov 15   ;;  %v1627_v23 = vmov 12   ;;  %v1628_v25 = vmov 13   ;;  %v1142_v31 = vld [vmem:[%s1898_s29] sm:$0xff]   ;;  %s1110_s15 = sshll.u32 %s1889_s26, 4 }
  0x9d   : > { %1311 = vperm.xlu1 %1309, %v1912_v5   ;;  %1299 = vperm.xlu0 %1297, %v1912_v5   ;;  %vm1629_vm0 = vmmov 0   ;;  %v392_v29 = vlaneseq  ;;  %v1143_v33 = vunpack.c.l.bf16 %v1142_v31  ;;  %s338_s4 = scalar_lea.vmem [#allocation10], %s1110_s15  ;;  %s1136_s20 = sshll.u32 %s1689_s25, 8 }
  0x9e   : > { %1164 = vmatpush3.bf16.msra.mxu0 %v1394_v14  ;;  %1179 = vmatprep.mubr.msk.bf16.mxu0 %vm1629_vm0, %v1622_v15  ;;  %s979_s13 = sshll.u32 %s338_s4, 4  ;;  %s2212_s0 = scalar_lea.hbm %s2262_s6, %s1136_s20  ;;  %s2207_s13 = int_to_ptr.vmem [resolvable:$true] %s979_s13 }
  0x9f   : > { %1165 = vmatprep.subr.bf16.mxu0 %v1622_v15  ;;  %1199 = vmatprep.mubr.msk.bf16.mxu1 %vm1629_vm0, %v1622_v15  ;;  %v393_v30 = vshrl.u32 %v392_v29, 7  ;;  %s966_s10 = scalar_lea.sflag [#allocation4], %s1889_s26  ;;  %s1526_s12 = scalar_lea.vmem %s2207_s13, 256 }
  0xa0   : > { %p1527_p1 = scmp.ne.s32.totalorder %s2207_s13, %s1526_s12  ;;  %p2310_p13 = scmp.ne.s32.totalorder %s2290_s9, 0 }
  0xa1   : > { %1315 = vset.pattern.permute.xlu1 %v1614_v6  ;;  %1303 = vset.pattern.permute.xlu0 %v1615_v7  ;;  %v1942_v32 = vsub.s32 0, %v393_v30  ;;  %v1944_v34 = vsub.s32 2, %v393_v30  ;;  %v1950_v37 = vsub.s32 1, %v393_v30  ;;  %v1955_v41 = vsub.s32 3, %v393_v30  ;;  %s1630_s25 = smov [#allocation10]  }
  0xa2   : > { %1317 = vperm.xlu1 %1315, %v1912_v5   ;;  %1305 = vperm.xlu0 %1303, %v1912_v5   ;;  %v1965_v48 = vsub.s32 4, %v393_v30  ;;  %v1967_v49 = vsub.s32 5, %v393_v30  ;;  %v1984_v61 = vsub.s32 6, %v393_v30  ;;  %p1528_p6 = pnand %p1527_p1, %p2310_p13  ;;  %s1530_s2 = sshll.u32 %s1630_s25, 4  ;;  %s1531_s2 = int_to_ptr.vmem [resolvable:$false] %s1530_s2 }
  0xa3   : > { %1166 = vmatpush3.bf16.msra.mxu0 %v1395_v18  ;;  %v395_v38 = vrot.slane %v1143_v33, %v1942_v32  ;;  %v425_v42 = vrot.slane %v1143_v33, %v1944_v34  ;;  %v409_v43 = vrot.slane %v1143_v33, %v1950_v37  ;;  %v441_v54 = vrot.slane %v1143_v33, %v1955_v41  ;;  %s1532_s19 = scalar_lea.vmem %s1531_s2, 512  ;;  %p1533_p4 = scmp.lt.s32.totalorder %s2207_s13, %s1531_s2 }
  0xa4   : > { %1167 = vmatprep.subr.bf16.mxu0 %v1622_v15  ;;  %v457_v59 = vrot.slane %v1143_v33, %v1965_v48  ;;  %v473_v60 = vrot.slane %v1143_v33, %v1967_v49  ;;  %p1529_p10 = pneg %p1528_p6  ;;  %p1534_p5 = scmp.lt.s32.totalorder %s1532_s19, %s1526_s12 }
  0xa6   : > { %1321 = vset.pattern.permute.xlu1 %v1616_v8  ;;  %1327 = vset.pattern.permute.xlu0 %v1617_v9  ;;  %p1535_p3 = por %p1534_p5, %p1533_p4 }
  0xa7   : > { %1323 = vperm.xlu1 %1321, %v1912_v5   ;;  %1329 = vperm.xlu0 %1327, %v1912_v5  }
  0xa8   : > { %1168 = vmatpush3.bf16.msra.mxu0 %v1396_v19  ;;  %p1536_p7 = pnand %p1535_p3, %p1529_p10 }
  0xa9   : > { %1169 = vmatprep.subr.bf16.mxu0 %v1622_v15 }
  0xab   : > { %1333 = vset.pattern.permute.xlu1 %v1618_v10  ;;  %1345 = vset.pattern.permute.xlu0 %v1619_v11 }
  0xac   : > { %1335 = vperm.xlu1 %1333, %v1912_v5   ;;  %1347 = vperm.xlu0 %1345, %v1912_v5  }
  0xad   : > { %1170 = vmatpush3.bf16.msra.mxu0 %v1397_v22  ;;  %v2015_v22 = vunpack.c.h.bf16 %v1142_v31 }
  0xae   : > { %1171 = vmatprep.subr.bf16.mxu0 %v1622_v15 }
  0xb0   : > { %1339 = vset.pattern.permute.xlu1 %v1620_v12  ;;  %1363 = vset.pattern.permute.xlu0 %v1621_v13 }
  0xb1   : > { %1341 = vperm.xlu1 %1339, %v1912_v5   ;;  %1365 = vperm.xlu0 %1363, %v1912_v5  }
  0xb2   : > { %1172 = vmatpush3.bf16.msra.mxu0 %v1398_v24 }
  0xb3   : > { %1173 = vmatprep.subr.bf16.mxu0 %v1622_v15 }
  0xb5   : > { %1351 = vset.pattern.permute.xlu1 %v1623_v16  ;;  %1381 = vset.pattern.permute.xlu0 %v1624_v17  ;;  %v2006_v17 = vsub.s32 7, %v393_v30 }
  0xb6   : > { %1353 = vperm.xlu1 %1351, %v1912_v5   ;;  %1383 = vperm.xlu0 %1381, %v1912_v5  }
  0xb7   : > { %1174 = vmatpush3.bf16.msra.mxu0 %v1399_v26 }
  0xb8   : > { %1175 = vmatprep.subr.bf16.mxu0 %v1622_v15 }
  0xba   : > { %1357 = vset.pattern.permute.xlu1 %v1625_v20  ;;  %1393 = vset.pattern.permute.xlu0 %v1626_v21  ;;  %v489_v20 = vrot.slane %v1143_v33, %v1984_v61 }
  0xbb   : > { %1359 = vperm.xlu1 %1357, %v1912_v5   ;;  %1176 = vmatpush3.bf16.msra.mxu0 %v1400_v27  ;;  %v505_v27 = vrot.slane %v1143_v33, %v2006_v17 }
  0xbc   : > { %1177 = vmatprep.subr.bf16.mxu0 %v1622_v15 }
  0xbf   : > { %1369 = vset.pattern.permute.xlu1 %v1627_v23  ;;  %1178 = vmatpush3.bf16.msra.mxu0 %v1401_v28 }
  0xc0   : > { %1371 = vperm.xlu1 %1369, %v1912_v5  }
  0xc4   : > { %1375 = vset.pattern.permute.xlu1 %v1628_v25 }
  0xc5   : > { %1377 = vperm.xlu1 %1375, %v1912_v5  }
  0xc9   : > { %1387 = vset.pattern.permute.xlu1 %v1626_v21 }
  0xca   : > { %1389 = vperm.xlu1 %1387, %v1912_v5  }
 0x11c   : > { %v1946_v35 = vpop.permute.xlu1 %1311  ;;  %v1948_v36 = vpop.permute.xlu0 %1299 }
 0x11d   : > { %v1302_v39 = vunpack.i.h.bf16 %v1948_v36  ;;  %v1301_v40 = vunpack.i.l.bf16 %v1948_v36  ;;  %v1314_v44 = vunpack.i.h.bf16 %v1946_v35  ;;  %v1313_v45 = vunpack.i.l.bf16 %v1946_v35 }
 0x11f   : > { %v397_v50 = vmul.f32 %v1302_v39, %v395_v38  ;;  %v396_v51 = vmul.f32 %v1301_v40, %v395_v38  ;;  %v427_v62 = vmul.f32 %v1314_v44, %v425_v42  ;;  %v426_v63 = vmul.f32 %v1313_v45, %v425_v42 }
 0x121   : > { %v1961_v46 = vpop.permute.xlu1 %1317  ;;  %v1963_v47 = vpop.permute.xlu0 %1305 }
 0x122   : > { %v1308_v52 = vunpack.i.h.bf16 %v1963_v47  ;;  %v1307_v53 = vunpack.i.l.bf16 %v1963_v47  ;;  %v1320_v55 = vunpack.i.h.bf16 %v1961_v46  ;;  %v1319_v56 = vunpack.i.l.bf16 %v1961_v46 }
 0x124   : > { %v411_v57 = vmul.f32 %v1308_v52, %v409_v43  ;;  %v410_v58 = vmul.f32 %v1307_v53, %v409_v43  ;;  %v443_v8 = vmul.f32 %v1320_v55, %v441_v54  ;;  %v442_v9 = vmul.f32 %v1319_v56, %v441_v54 }
 0x125   : > { %v521_v43 = vrot.slane %v2015_v22, %v1942_v32 }
 0x126   : > { %v412_v0 = vadd.f32 %v410_v58, %v396_v51  ;;  %v413_v1 = vadd.f32 %v411_v57, %v397_v50  ;;  %v1990_v2 = vpop.permute.xlu1 %1323  ;;  %v1992_v3 = vpop.permute.xlu0 %1329 }
 0x127   : > { %v1326_v4 = vunpack.i.h.bf16 %v1990_v2  ;;  %v1325_v5 = vunpack.i.l.bf16 %v1990_v2  ;;  %v1332_v6 = vunpack.i.h.bf16 %v1992_v3  ;;  %v1331_v7 = vunpack.i.l.bf16 %v1992_v3 }
 0x128   : > { %v428_v10 = vadd.f32 %v426_v63, %v412_v0  ;;  %v429_v11 = vadd.f32 %v427_v62, %v413_v1  ;;  %v537_v62 = vrot.slane %v2015_v22, %v1950_v37 }
 0x129   : > { %v459_v12 = vmul.f32 %v1326_v4, %v457_v59  ;;  %v458_v13 = vmul.f32 %v1325_v5, %v457_v59  ;;  %v475_v18 = vmul.f32 %v1332_v6, %v473_v60  ;;  %v474_v19 = vmul.f32 %v1331_v7, %v473_v60 }
 0x12a   : > { %v444_v14 = vadd.f32 %v442_v9, %v428_v10  ;;  %v445_v16 = vadd.f32 %v443_v8, %v429_v11 }
 0x12b   : > { %v2013_v21 = vpop.permute.xlu1 %1335  ;;  %v2020_v28 = vpop.permute.xlu0 %1347 }
 0x12c   : > { %v460_v23 = vadd.f32 %v458_v13, %v444_v14  ;;  %v461_v24 = vadd.f32 %v459_v12, %v445_v16  ;;  %v1338_v25 = vunpack.i.h.bf16 %v2013_v21  ;;  %v1337_v26 = vunpack.i.l.bf16 %v2013_v21 }
 0x12d   : > { %v1350_v33 = vunpack.i.h.bf16 %v2020_v28  ;;  %v1349_v54 = vunpack.i.l.bf16 %v2020_v28  ;;  %v553_v12 = vrot.slane %v2015_v22, %v1944_v34 }
 0x12e   : > { %v476_v29 = vadd.f32 %v474_v19, %v460_v23  ;;  %v477_v30 = vadd.f32 %v475_v18, %v461_v24  ;;  %v491_v38 = vmul.f32 %v1338_v25, %v489_v20  ;;  %v490_v42 = vmul.f32 %v1337_v26, %v489_v20 }
 0x12f   : > { %v523_v1 = vmul.f32 %v1350_v33, %v521_v43  ;;  %v522_v8 = vmul.f32 %v1349_v54, %v521_v43  ;;  %v569_v23 = vrot.slane %v2015_v22, %v1955_v41 }
 0x130   : > { %v2026_v31 = vpop.permute.xlu1 %1341  ;;  %v492_v57 = vadd.f32 %v490_v42, %v476_v29  ;;  %v493_v58 = vadd.f32 %v491_v38, %v477_v30  ;;  %v2050_v13 = vpop.permute.xlu0 %1365 }
 0x131   : > { %v1344_v50 = vunpack.i.h.bf16 %v2026_v31  ;;  %v1343_v51 = vunpack.i.l.bf16 %v2026_v31  ;;  %v2270_v29 = vunpack.i.h.bf16 %v2050_v13  ;;  %v2271_v30 = vunpack.i.l.bf16 %v2050_v13 }
 0x133   : > { %v507_v59 = vmul.f32 %v1344_v50, %v505_v27  ;;  %v506_v60 = vmul.f32 %v1343_v51, %v505_v27 }
 0x135   : > { %v508_v63 = vadd.f32 %v506_v60, %v492_v57  ;;  %v509_v0 = vadd.f32 %v507_v59, %v493_v58  ;;  %v2044_v9 = vpop.permute.xlu1 %1353  ;;  %v585_v58 = vrot.slane %v2015_v22, %v1965_v48 }
 0x136   : > { %v2276_v10 = vunpack.i.h.bf16 %v2044_v9  ;;  %v2278_v11 = vunpack.i.l.bf16 %v2044_v9 }
 0x137   : > { %v524_v14 = vadd.f32 %v522_v8, %v508_v63  ;;  %v525_v16 = vadd.f32 %v523_v1, %v509_v0  ;;  %v570_v63 = vmul.f32 %v2271_v30, %v569_v23  ;;  %v2076_v1 = vpop.permute.xlu0 %1383 }
 0x138   : > { %v539_v18 = vmul.f32 %v2276_v10, %v537_v62  ;;  %v538_v19 = vmul.f32 %v2278_v11, %v537_v62  ;;  %v571_v62 = vmul.f32 %v2270_v29, %v569_v23 }
 0x13a   : > { %v2056_v20 = vpop.permute.xlu1 %1359  ;;  %v540_v38 = vadd.f32 %v538_v19, %v524_v14  ;;  %v541_v42 = vadd.f32 %v539_v18, %v525_v16  ;;  %v617_v16 = vrot.slane %v2015_v22, %v1984_v61  ;;  %v2277_v18 = vunpack.i.h.bf16 %v2076_v1 }
 0x13b   : > { %v2272_v24 = vunpack.i.h.bf16 %v2056_v20  ;;  %v2273_v27 = vunpack.i.l.bf16 %v2056_v20  ;;  %v2279_v19 = vunpack.i.l.bf16 %v2076_v1  ;;  %v2303_v28 = vunpack.i.h.bf16 %v2056_v20 }
 0x13d   : > { %v555_v43 = vmul.f32 %v2272_v24, %v553_v12  ;;  %v554_v57 = vmul.f32 %v2273_v27, %v553_v12  ;;  %v601_v12 = vrot.slane %v2015_v22, %v1967_v49  ;;  %v619_v24 = vmul.f32 %v2277_v18, %v617_v16 }
 0x13e   : > { %v618_v27 = vmul.f32 %v2279_v19, %v617_v16 }
 0x13f   : > { %v556_v59 = vadd.f32 %v554_v57, %v540_v38  ;;  %v557_v60 = vadd.f32 %v555_v43, %v541_v42  ;;  %v2074_v0 = vpop.permute.xlu1 %1371 }
 0x140   : > { %v2274_v8 = vunpack.i.h.bf16 %v2074_v0  ;;  %v2275_v14 = vunpack.i.l.bf16 %v2074_v0 }
 0x141   : > { %v572_v38 = vadd.f32 %v570_v63, %v556_v59  ;;  %v573_v23 = vadd.f32 %v571_v62, %v557_v60  ;;  %v633_v63 = vrot.slane %v2015_v22, %v2006_v17  ;;  %v1402_v22 = vld [vmem:[#allocation8] sm:$0xff]  }
 0x142   : > { %v587_v42 = vmul.f32 %v2274_v8, %v585_v58  ;;  %v586_v43 = vmul.f32 %v2275_v14, %v585_v58  ;;  %1184 = vmatpush3.bf16.msra.mxu1 %v1402_v22 }
 0x143   : > { %1185 = vmatprep.subr.bf16.mxu1 %v1622_v15 }
 0x144   : > { %v2090_v57 = vpop.permute.xlu1 %1377  ;;  %v588_v59 = vadd.f32 %v586_v43, %v572_v38  ;;  %v589_v60 = vadd.f32 %v587_v42, %v573_v23 }
 0x145   : > { %v1380_v29 = vunpack.i.h.bf16 %v2090_v57  ;;  %v1379_v30 = vunpack.i.l.bf16 %v2090_v57 }
 0x147   : > { %v603_v62 = vmul.f32 %v1380_v29, %v601_v12  ;;  %v602_v58 = vmul.f32 %v1379_v30, %v601_v12 }
 0x149   : > { %v604_v8 = vadd.f32 %v602_v58, %v588_v59  ;;  %v605_v14 = vadd.f32 %v603_v62, %v589_v60  ;;  %v2104_v10 = vpop.permute.xlu1 %1389  ;;  %v1403_v59 = vld [vmem:[#allocation8 + $0x8] sm:$0xff]   ;;  %v1404_v60 = vld [vmem:[#allocation8 + $0x10] sm:$0xff]   ;;  %v1111_v62 = vld [vmem:[%s2259_s3] ss:$0 sm:$0xff] }
 0x14a   : > { %v1392_v18 = vunpack.i.h.bf16 %v2104_v10  ;;  %v1391_v11 = vunpack.i.l.bf16 %v2104_v10  ;;  %1186 = vmatpush3.bf16.msra.mxu1 %v1403_v59 }
 0x14b   : > { %v620_v16 = vadd.f32 %v618_v27, %v604_v8  ;;  %v621_v38 = vadd.f32 %v619_v24, %v605_v14  ;;  %1187 = vmatprep.subr.bf16.mxu1 %v1622_v15  ;;  %v1405_v24 = vld [vmem:[#allocation8 + $0x18] sm:$0xff]   ;;  %v1406_v27 = vld [vmem:[#allocation8 + $0x20] sm:$0xff]   ;;  %v1407_v8 = vld [vmem:[#allocation8 + $0x28] sm:$0xff]  }
 0x14c   : > { %v635_v23 = vmul.f32 %v1392_v18, %v633_v63  ;;  %v634_v42 = vmul.f32 %v1391_v11, %v633_v63  ;;  %v1408_v14 = vld [vmem:[#allocation8 + $0x30] sm:$0xff]  }
 0x14e   : > { %v636_v12 = vadd.f32 %v634_v42, %v620_v16  ;;  %v637_v43 = vadd.f32 %v635_v23, %v621_v38  ;;  %1188 = vmatpush3.bf16.msra.mxu1 %v1404_v60 }
 0x14f   : > { %1189 = vmatprep.subr.bf16.mxu1 %v1622_v15 }
 0x150   : > { %v638_v19 = vpack.c.bf16 %v637_v43, %v636_v12 }
 0x152   : > { %1180 = vmatmul.mubr.bf16.vlgmr.msra.gmra.mrb[0].mxu0 %v638_v19  ;;  %1190 = vmatpush3.bf16.msra.mxu1 %v1405_v24  ;;  %v1409_v19 = vld [vmem:[#allocation8 + $0x38] sm:$0xff]  }
 0x153   : > { %1191 = vmatprep.subr.bf16.mxu1 %v1622_v15 }
 0x156   : > { %1192 = vmatpush3.bf16.msra.mxu1 %v1406_v27 }
 0x157   : > { %1193 = vmatprep.subr.bf16.mxu1 %v1622_v15 }
 0x15a   : > { %1194 = vmatpush3.bf16.msra.mxu1 %v1407_v8 }
 0x15b   : > { %1195 = vmatprep.subr.bf16.mxu1 %v1622_v15 }
 0x15e   : > { %1196 = vmatpush3.bf16.msra.mxu1 %v1408_v14 }
 0x15f   : > { %1197 = vmatprep.subr.bf16.mxu1 %v1622_v15 }
 0x162   : > { %1198 = vmatpush3.bf16.msra.mxu1 %v1409_v19 }
 0x225   : > { %v727_v58 = vpop.f32.mrb[0].mxu0 }
 0x226   : > { %v728_v63 = vadd.f32 %v1111_v62, %v727_v58  ;;  %v1181_v16 = vpop.f32.mrb[1].mxu0 }
 0x227   : > { %v730_v38 = vpop.f32.mrb[2].mxu0 }
 0x228   : > { %v731_v23 = vadd.f32 %v1111_v62, %v730_v38  ;;  %v1182_v42 = vpop.f32.mrb[3].mxu0  ;;  %v734_v12 = vmax.f32 %v728_v63, 0.0 }
 0x22a   : > { %v735_v43 = vmax.f32 %v731_v23, 0.0 }
 0x22c   : > { %v736_v22 = vpack.c.bf16 %v735_v43, %v734_v12 }
 0x22e   : > { %v737_v59 = vunpack.c.l.bf16 %v736_v22 }
 0x230   : > { %v742_v60 = vrot.slane %v737_v59, %v1942_v32  ;;  %v748_v24 = vrot.slane %v737_v59, %v1950_v37  ;;  %v756_v15 = vrot.slane %v737_v59, %v1944_v34  ;;  %v764_v27 = vrot.slane %v737_v59, %v1955_v41 }
 0x231   : > { %v772_v58 = vrot.slane %v737_v59, %v1965_v48  ;;  %v788_v42 = vrot.slane %v737_v59, %v1984_v61 }
 0x232   : > { %v743_v8 = vmul.f32 %v1301_v40, %v742_v60  ;;  %v744_v14 = vmul.f32 %v1302_v39, %v742_v60  ;;  %v749_v19 = vmul.f32 %v1307_v53, %v748_v24  ;;  %v750_v62 = vmul.f32 %v1308_v52, %v748_v24 }
 0x233   : > { %v757_v38 = vmul.f32 %v1313_v45, %v756_v15  ;;  %v758_v23 = vmul.f32 %v1314_v44, %v756_v15  ;;  %v780_v40 = vrot.slane %v737_v59, %v1967_v49  ;;  %v765_v53 = vmul.f32 %v1319_v56, %v764_v27 }
 0x234   : > { %v751_v63 = vadd.f32 %v749_v19, %v743_v8  ;;  %v752_v16 = vadd.f32 %v750_v62, %v744_v14  ;;  %v766_v47 = vmul.f32 %v1320_v55, %v764_v27  ;;  %v738_v52 = vunpack.c.h.bf16 %v736_v22 }
 0x235   : > { %v773_v45 = vmul.f32 %v1325_v5, %v772_v58  ;;  %v774_v35 = vmul.f32 %v1326_v4, %v772_v58  ;;  %v796_v44 = vrot.slane %v737_v59, %v2006_v17  ;;  %v781_v56 = vmul.f32 %v1331_v7, %v780_v40 }
 0x236   : > { %v759_v36 = vadd.f32 %v757_v38, %v751_v63  ;;  %v760_v39 = vadd.f32 %v758_v23, %v752_v16  ;;  %v782_v46 = vmul.f32 %v1332_v6, %v780_v40  ;;  %v789_v55 = vmul.f32 %v1337_v26, %v788_v42 }
 0x237   : > { %v790_v5 = vmul.f32 %v1338_v25, %v788_v42  ;;  %v804_v2 = vrot.slane %v738_v52, %v1942_v32  ;;  %v797_v4 = vmul.f32 %v1343_v51, %v796_v44  ;;  %v798_v7 = vmul.f32 %v1344_v50, %v796_v44 }
 0x238   : > { %v767_v12 = vadd.f32 %v765_v53, %v759_v36  ;;  %v768_v43 = vadd.f32 %v766_v47, %v760_v39  ;;  %v812_v3 = vrot.slane %v738_v52, %v1950_v37  ;;  %v820_v6 = vrot.slane %v738_v52, %v1944_v34 }
 0x239   : > { %v805_v21 = vmul.f32 %v1349_v54, %v804_v2  ;;  %v806_v32 = vmul.f32 %v1350_v33, %v804_v2  ;;  %v828_v25 = vrot.slane %v738_v52, %v1955_v41  ;;  %v2300_v19 = vunpack.i.l.bf16 %v2044_v9 }
 0x23a   : > { %v775_v60 = vadd.f32 %v773_v45, %v767_v12  ;;  %v776_v24 = vadd.f32 %v774_v35, %v768_v43  ;;  %v2301_v50 = vunpack.i.h.bf16 %v2044_v9  ;;  %v836_v34 = vrot.slane %v738_v52, %v1965_v48 }
 0x23b   : > { %v813_v31 = vmul.f32 %v2300_v19, %v812_v3  ;;  %v2302_v63 = vunpack.i.l.bf16 %v2056_v20  ;;  %v822_v33 = vmul.f32 %v2303_v28, %v820_v6  ;;  %v844_v41 = vrot.slane %v738_v52, %v1967_v49 }
 0x23c   : > { %v783_v22 = vadd.f32 %v781_v56, %v775_v60  ;;  %v784_v15 = vadd.f32 %v782_v46, %v776_v24  ;;  %v814_v37 = vmul.f32 %v2301_v50, %v812_v3  ;;  %v2304_v23 = vunpack.i.l.bf16 %v2050_v13 }
 0x23d   : > { %v821_v54 = vmul.f32 %v2302_v63, %v820_v6  ;;  %v2305_v9 = vunpack.i.h.bf16 %v2050_v13  ;;  %v2306_v48 = vunpack.i.l.bf16 %v2074_v0  ;;  %v2307_v42 = vunpack.i.h.bf16 %v2074_v0 }
 0x23e   : > { %v791_v59 = vadd.f32 %v789_v55, %v783_v22  ;;  %v792_v27 = vadd.f32 %v790_v5, %v784_v15  ;;  %v829_v40 = vmul.f32 %v2304_v23, %v828_v25  ;;  %v852_v20 = vrot.slane %v738_v52, %v1984_v61 }
 0x23f   : > { %v830_v36 = vmul.f32 %v2305_v9, %v828_v25  ;;  %v837_v39 = vmul.f32 %v2306_v48, %v836_v34  ;;  %v838_v12 = vmul.f32 %v2307_v42, %v836_v34  ;;  %v845_v49 = vmul.f32 %v1379_v30, %v844_v41 }
 0x240   : > { %v799_v26 = vadd.f32 %v797_v4, %v791_v59  ;;  %v800_v8 = vadd.f32 %v798_v7, %v792_v27  ;;  %v846_v13 = vmul.f32 %v1380_v29, %v844_v41  ;;  %v860_v35 = vrot.slane %v738_v52, %v2006_v17  ;;  %v1120_v52 = vld [vmem:[%s2261_s5] ss:$0 sm:$0xff] }
 0x241   : > { %v2308_v24 = vunpack.i.l.bf16 %v2076_v1  ;;  %v2309_v0 = vunpack.i.h.bf16 %v2076_v1 }
 0x242   : > { %v807_v51 = vadd.f32 %v805_v21, %v799_v26  ;;  %v808_v14 = vadd.f32 %v806_v32, %v800_v8  ;;  %v861_v30 = vmul.f32 %v1391_v11, %v860_v35  ;;  %v862_v57 = vmul.f32 %v1392_v18, %v860_v35 }
 0x243   : > { %v853_v56 = vmul.f32 %v2308_v24, %v852_v20  ;;  %v854_v46 = vmul.f32 %v2309_v0, %v852_v20 }
 0x244   : > { %v815_v62 = vadd.f32 %v813_v31, %v807_v51  ;;  %v816_v58 = vadd.f32 %v814_v37, %v808_v14 }
 0x246   : > { %v823_v16 = vadd.f32 %v821_v54, %v815_v62  ;;  %v824_v38 = vadd.f32 %v822_v33, %v816_v58 }
 0x248   : > { %v831_v53 = vadd.f32 %v829_v40, %v823_v16  ;;  %v832_v47 = vadd.f32 %v830_v36, %v824_v38 }
 0x24a   : > { %v839_v43 = vadd.f32 %v837_v39, %v831_v53  ;;  %v840_v45 = vadd.f32 %v838_v12, %v832_v47 }
 0x24c   : > { %v847_v44 = vadd.f32 %v845_v49, %v839_v43  ;;  %v848_v60 = vadd.f32 %v846_v13, %v840_v45 }
 0x24e   : > { %v855_v61 = vadd.f32 %v853_v56, %v847_v44  ;;  %v856_v55 = vadd.f32 %v854_v46, %v848_v60 }
 0x250   : > { %v863_v29 = vadd.f32 %v861_v30, %v855_v61  ;;  %v864_v22 = vadd.f32 %v862_v57, %v856_v55 }
 0x252   : > { %v865_v17 = vpack.c.bf16 %v864_v22, %v863_v29 }
 0x254   : > { %1200 = vmatmul.mubr.bf16.vlgmr.msra.gmra.mrb[0].mxu1 %v865_v17 }
 0x327   : > { %v954_v1 = vpop.f32.mrb[0].mxu1 }
 0x328   : > { %v955_v15 = vadd.f32 %v1120_v52, %v954_v1  ;;  %v1201_v5 = vpop.f32.mrb[1].mxu1 }
 0x329   : > { %v957_v11 = vpop.f32.mrb[2].mxu1 }
 0x32a   : > { %v961_v10 = vmax.f32 %v955_v15, 0.0  ;;  %v958_v18 = vadd.f32 %v1120_v52, %v957_v11  ;;  %v1202_v2 = vpop.f32.mrb[3].mxu1 }
 0x32c   : > { %963 = vst [vmem:[%s338_s4] sm:$0xff] %v961_v10  ;;  %v962_v4 = vmax.f32 %v958_v18, 0.0 }
 0x32e   : > { %964 = vst [vmem:[%s338_s4 + $0x8] sm:$0xff] %v962_v4 }
 0x32f   : > { %1539 = shalt.err (!%p1536_p7)
}
 0x330   : > { %s1540_s18 = scalar_lea.hbm %s2212_s0, 256  ;;  %s1544_s14 = scalar_lea.hbm %s2262_s6, 512 }
 0x331   : > { %p1541_p9 = scmp.ne.s32.totalorder %s2212_s0, %s1540_s18  ;;  %p1545_p11 = scmp.lt.u32.totalorder %s2212_s0, %s2262_s6 }
 0x332   : > { %p1546_p2 = scmp.lt.u32.totalorder %s1544_s14, %s1540_s18  ;;  %p1548_p1 = scmp.lt.u32.totalorder %s1540_s18, %s2212_s0 }
 0x333   : > { %p1542_p0 = pnand %p1541_p9, %p2310_p13 }
 0x334   : > { %p1547_p12 = por %p1546_p2, %p1545_p11 }
 0x335   : > { %p1543_p8 = pneg %p1542_p0 }
 0x336   : > { %p1549_p6 = por %p1548_p1, %p1547_p12 }
 0x338   : > { %p1550_p10 = pnand %p1549_p6, %p1543_p8 }
 0x33a   : > { %1553 = shalt.err (!%p1550_p10)
}
 0x33b   : > { %s1631_s30 = smov 128   ;;  %s1632_s4 = smov 8  }
 0x33c   : > { %1215 = dma.vmem_to_hbm [thread:$0]  (%p2310_p13), %s2207_s13, 256, %s2212_s0, %s966_s10, %s1631_s30, %s1631_s30, %s1632_s4  }
 0x33d PF: > { %s994_s20 = sand.u32 1, %s1592_s21   ;;  %p2311_p4 = scmp.ne.s32.totalorder %s2284_s28, 0 }
 0x33e   : > { %p2312_p5 = scmp.ge.s32.totalorder %s1604_s24, 2  ;;  %s995_s16 = scalar_lea.sflag [#allocation4], %s994_s20 }
 0x340   : > { %p1232_p3 = pnand %p2312_p5, %p2311_p4 }
 0x342   : > { %1587 = dma.done.wait (!%p1232_p3), %s995_s16, 256  }
 0x343   : > { %1589 = vsyncadd (!%p1232_p3), %s995_s16, 4294967040  ;;  %p23_p7 = scmp.ge.s32.totalorder %s1784_s8, 4   ;;  %s2313_s21 = smov %s1596_s22 }
 0x344   : > { %s2314_s22 = smov %s1600_s23  ;;  %s2315_s23 = smov %s1800_s11 }
 0x345   : > { %s2316_s24 = smov %s1784_s8  ;;  %25 = sbr.rel (!%p23_p7) target bundleno = 12 (0xc), region = 110 }
 0x34c   :  { %1000 = vsyncpa [#allocation3], 1 }
 0x34d   :  { %1002 = vsyncpa [#allocation3 + $0x1], 1 }
 0x34e   :  { %1003 = vsyncpa [#allocation6], 1 }
 0x34f   :  { %1005 = vsyncpa [#allocation6 + $0x1], 1 }
 0x350   :  { %1006 = vsyncpa [#allocation9], 1 }
 0x351   :  { %1007 = vsyncpa [#allocation4], 1 }
 0x352   :  { %1009 = vsyncpa [#allocation4 + $0x1], 1 }

</bundles_post_ra>
